<compile_context>
chip_gen: v6e
topology: v6e:2x2x1
jax: 0.10.0
libtpu: 0.0.40
codegen_flags: <defaults>
</compile_context>

<pallas_src>
import jax
import jax.numpy as jnp
from jax import lax
from jax.experimental import pallas as pl
from jax.experimental.pallas import tpu as pltpu


# ---------------------------------------------------------------------------
# Kernel: full MLP on one (num_scalars, tm) tile (rows on the lane axis).
# ---------------------------------------------------------------------------
def _make_cgmlp_kernel(in_dims, out_dims, ck, n_chunks, has_mask):
    n_layers = len(in_dims)
    offs = [0]
    for d in in_dims:
        offs.append(offs[-1] + d)

    def kernel(*refs):
        if has_mask:
            x_ref, w_ref, b_ref, mask_ref, o_ref = refs
        else:
            x_ref, w_ref, b_ref, o_ref = refs
        cdt = w_ref.dtype  # compute dtype (bf16 by default, f32 optional)

        # Tiny packed weight / bias slabs: loaded once per grid step, sliced
        # statically per layer.
        w_all = w_ref[...]                                  # (out_max, sum_in)
        b_all = b_ref[...]                                  # (out_max, L) f32
        w_l = [w_all[:, offs[i]:offs[i + 1]] for i in range(n_layers)]
        b_l = [b_all[:, i:i + 1] for i in range(n_layers)]

        def process(start):
            h = x_ref[:, pl.ds(start, ck)].astype(cdt)      # (in0, ck)
            z = None
            for li in range(n_layers):
                z = jnp.dot(w_l[li], h, preferred_element_type=jnp.float32)
                od = out_dims[li]
                z = z[:od, :] + b_l[li][:od, :]
                if li < n_layers - 1:
                    # Folded sigmoid: plain tanh on the EUP, affine absorbed
                    # into the (pre-scaled) weights/biases.
                    h = jnp.tanh(z.astype(cdt))
            out = z                                          # (out_dims[-1], ck)
            if has_mask:
                m = jnp.broadcast_to(mask_ref[:, pl.ds(start, ck)], out.shape)
                out = jnp.where(m != 0.0, out, 0.0)
            o_ref[:, pl.ds(start, ck)] = out.astype(o_ref.dtype)

        if n_chunks == 1:
            process(0)
        else:
            def body(j, carry):
                process(pl.multiple_of(j * ck, ck))
                return carry
            lax.fori_loop(0, n_chunks, body, 0)

    return kernel


def _choose_tiles(M, tm_max=4096, chunk=512, min_grid=2):
    """Pick (lane_tile, chunk) for the M (=B*A rows) axis."""
    if M <= 128:
        return M, M                     # exact single block (== full array dim)
    if M <= chunk:
        tm = ((M + 127) // 128) * 128
        return tm, tm
    tm = min(tm_max, ((M + chunk - 1) // chunk) * chunk)
    # Keep >= min_grid grid steps so ("parallel",) can use both v7x
    # TensorCores (set min_grid=4 when tuning specifically for v7x).
    while tm > chunk and -(-M // tm) < min_grid:
        tm -= chunk
    return tm, chunk


def cgmlp_mlp_pallas(xT, wpack, bpack, in_dims, out_dims, maskT=None, *,
                     tm_max=4096, chunk=512, min_grid=2):
    """Run the CGMLP hot path on the transposed (feature, row) slab.

    xT:     (num_scalars, M) float32, rows (B*A) on the lane axis.
    wpack:  (out_max, sum(in_dims)) folded/packed/transposed weights (compute dtype).
    bpack:  (out_max, n_layers) folded/packed biases (float32).
    maskT:  optional (1, M) float32 (nonzero = keep).
    """
    ns, M = xT.shape
    assert ns == in_dims[0]
    final_out = out_dims[-1]

    tm, ck = _choose_tiles(M, tm_max, chunk, min_grid)
    n_chunks = tm // ck
    grid = (pl.cdiv(M, tm),)
    has_mask = maskT is not None

    kernel = _make_cgmlp_kernel(list(in_dims), list(out_dims), ck, n_chunks,
                                has_mask)

    in_specs = [
        pl.BlockSpec((ns, tm), lambda i: (0, i)),
        pl.BlockSpec(wpack.shape, lambda i: (0, 0)),
        pl.BlockSpec(bpack.shape, lambda i: (0, 0)),
    ]
    args = [xT, wpack, bpack]
    if has_mask:
        in_specs.append(pl.BlockSpec((1, tm), lambda i: (0, i)))
        args.append(maskT)
    out_specs = pl.BlockSpec((final_out, tm), lambda i: (0, i))

    flops = 2 * M * sum(i * o for i, o in zip(in_dims, out_dims))
    transcendentals = M * sum(out_dims[:-1])
    bytes_accessed = int(
        xT.size * xT.dtype.itemsize
        + M * final_out * 4
        + (maskT.size * maskT.dtype.itemsize if has_mask else 0)
        + wpack.size * wpack.dtype.itemsize
        + bpack.size * bpack.dtype.itemsize)

    fn = pl.pallas_call(
        kernel,
        out_shape=jax.ShapeDtypeStruct((final_out, M), jnp.float32),
        grid_spec=pltpu.PrefetchScalarGridSpec(
            num_scalar_prefetch=0,
            grid=grid,
            in_specs=in_specs,
            out_specs=out_specs,
        ),
        compiler_params=pltpu.CompilerParams(
            dimension_semantics=("parallel",),
        ),
        cost_estimate=pl.CostEstimate(
            flops=int(flops),
            transcendentals=int(transcendentals),
            bytes_accessed=bytes_accessed,
        ),
    )
    return fn(*args)


# ---------------------------------------------------------------------------
# Weight preparation: fold sigmoid affine terms, pack all layers into 2 slabs.
# ---------------------------------------------------------------------------
def _fold_sigmoid_affine(params):
    """Fold sigmoid(z) = 0.5*tanh(0.5 z) + 0.5 into the weights (exact).

    params: list of (w (in,out), b (1,out)) float32, hidden layers then final.
    Returns list of (A (out,in), c (out,)) so that
        t_0 = tanh(A_0 x + c_0); t_i = tanh(A_i t_{i-1} + c_i); out = A_L t + c_L
    equals the original sigmoid MLP.
    """
    L = len(params)
    folded = []
    for i, (w, b) in enumerate(params):
        w = jnp.asarray(w, jnp.float32)
        wT = w.T                                   # (out, in)
        bb = jnp.asarray(b, jnp.float32).reshape(-1)
        colsum = jnp.sum(w, axis=0)                # (out,) == W^T @ ones
        if L == 1:                                 # no hidden layers
            A, c = wT, bb
        elif i == 0:                               # first hidden layer
            A, c = 0.5 * wT, 0.5 * bb
        elif i < L - 1:                            # middle hidden layers
            A, c = 0.25 * wT, 0.25 * colsum + 0.5 * bb
        else:                                      # final linear layer
            A, c = 0.5 * wT, 0.5 * colsum + bb
        folded.append((A, c))
    return folded


def _pack_params(folded, compute_dtype):
    out_dims = [int(A.shape[0]) for A, _ in folded]
    in_dims = [int(A.shape[1]) for A, _ in folded]
    out_max = max(out_dims)
    w_blocks, b_cols = [], []
    for (A, c), od in zip(folded, out_dims):
        pad = out_max - od
        w_blocks.append(jnp.pad(A, ((0, pad), (0, 0))))
        b_cols.append(jnp.pad(c, (0, pad)))
    wpack = jnp.concatenate(w_blocks, axis=1).astype(compute_dtype)
    bpack = jnp.stack(b_cols, axis=1).astype(jnp.float32)
    return wpack, bpack, in_dims, out_dims


# ---------------------------------------------------------------------------
# CGMLP module (JAX/Pallas version)
# ---------------------------------------------------------------------------
class CGMLPPallas:
    """JAX/Pallas version of lgn_levels.CGMLP (sigmoid activation)."""

    def __init__(self, tau, num_hidden=3, layer_width_mul=2,
                 key=jax.random.PRNGKey(0), compute_dtype=jnp.bfloat16,
                 tm_max=4096, chunk=512, min_grid=2):
        self.tau = tau
        num_scalars = 2 * tau[(0, 0)]
        self.num_scalars = num_scalars
        layer_width = layer_width_mul * num_scalars
        self.num_hidden = num_hidden
        self.compute_dtype = compute_dtype
        self.tm_max = tm_max
        self.chunk = chunk
        self.min_grid = min_grid

        # Layer (in, out) dims actually used by forward() (matches the live
        # path of the PyTorch module): hidden layers first, final linear last.
        if num_hidden > 0:
            dims = [(num_scalars, layer_width)]
            dims += [(layer_width, layer_width)] * (num_hidden - 1)
            dims += [(layer_width, num_scalars)]
        else:
            dims = [(num_scalars, num_scalars)]

        # Deterministic synthetic init (mimics nn.Linear's uniform bound).
        self.params = []
        for (fan_in, fan_out) in dims:
            key, kw, kb = jax.random.split(key, 3)
            bound = 1.0 / jnp.sqrt(float(fan_in))
            w = jax.random.uniform(kw, (fan_in, fan_out), jnp.float32,
                                   -bound, bound)
            b = jax.random.uniform(kb, (1, fan_out), jnp.float32,
                                   -bound, bound)
            self.params.append((w, b))

        folded = _fold_sigmoid_affine(self.params)
        (self.wpack, self.bpack,
         self.in_dims, self.out_dims) = _pack_params(folded, compute_dtype)

    def __call__(self, reps_in, mask=None):
        reps_out = dict(reps_in)
        x = reps_out.pop((0, 0))[..., 0]          # squeeze(-1): (2, B, A, T)
        two, B, A, T = x.shape
        assert two == 2 and 2 * T == self.num_scalars
        M = B * A

        # Transposed slab: rows on the lane axis, feature k = 2*t + c on the
        # sublane axis (same interleave as the PyTorch permute/view).
        # TODO(synk): fold this (2,B,A,T) <-> (2T, M) swizzle (and its inverse
        # below) into the kernel; an in-kernel lane<->sublane transpose of this
        # skinny slab does not lower cheaply/robustly in Mosaic today, so it
        # stays as two XLA transposes (one extra HBM pass on each side).
        xT = jnp.transpose(x, (3, 0, 1, 2)).reshape(self.num_scalars, M)
        xT = xT.astype(jnp.float32)

        maskT = None
        if mask is not None:
            # mask is broadcast over the feature axis (e.g. (B, A, 1) bool).
            m = jnp.reshape(jnp.asarray(mask), (B, A, -1))[..., :1]
            maskT = m.reshape(1, M).astype(jnp.float32)

        outT = cgmlp_mlp_pallas(
            xT, self.wpack, self.bpack, self.in_dims, self.out_dims, maskT,
            tm_max=self.tm_max, chunk=self.chunk, min_grid=self.min_grid)

        # (2T, M) -> (T, 2, B, A) -> (2, B, A, T, 1)
        y = outT.reshape(T, 2, B, A)
        y = jnp.transpose(y, (1, 2, 3, 0))[..., None]
        reps_out[(0, 0)] = y
        return reps_out

    # Pure-JAX float32 reference of the same forward (for verification).
    def reference(self, reps_in, mask=None):
        reps_out = dict(reps_in)
        x = reps_out.pop((0, 0))[..., 0]
        two, B, A, T = x.shape
        h = jnp.transpose(x, (1, 2, 3, 0)).reshape(B, A, self.num_scalars)
        h = h.astype(jnp.float32)
        for (w, b) in self.params[:-1]:
            h = jax.nn.sigmoid(h @ w + b[0])
        w, b = self.params[-1]
        h = h @ w + b[0]
        if mask is not None:
            m = jnp.reshape(jnp.asarray(mask), (B, A, -1))[..., :1]
            h = jnp.where(m, h, jnp.zeros_like(h))
        y = h.reshape(B, A, T, 2)
        y = jnp.transpose(y, (3, 0, 1, 2))[..., None]
        reps_out[(0, 0)] = y
        return reps_out


if __name__ == "__main__":
    key = jax.random.PRNGKey(0)
    k_model, k_x1, k_m1, k_x2, k_m2 = jax.random.split(key, 5)

    tau = {(0, 0): 4}                 # tau[0,0] = 4 -> num_scalars = 8, width 16
    T = tau[(0, 0)]

    # --- Test 1: float32 compute path, small M (exact single block), masked ---
    B1, A1 = 2, 16                    # M = 32 rows
    model_f32 = CGMLPPallas(tau, num_hidden=3, layer_width_mul=2, key=k_model,
                            compute_dtype=jnp.float32)
    reps1 = {(0, 0): jax.random.normal(k_x1, (2, B1, A1, T, 1), jnp.float32)}
    mask1 = jax.random.uniform(k_m1, (B1, A1, 1)) > 0.3
    out1 = model_f32(reps1, mask=mask1)
    jax.block_until_ready(out1[(0, 0)])
    ref1 = model_f32.reference(reps1, mask=mask1)
    assert out1[(0, 0)].shape == (2, B1, A1, T, 1)
    assert jnp.allclose(out1[(0, 0)], ref1[(0, 0)], atol=5e-5, rtol=5e-5)

    # --- Test 2: bf16 compute path (default), ragged M -> multi-step grid,
    #             inner chunk loop, partial last block, masked ---
    B2, A2 = 2, 600                   # M = 1200 -> tm=1024 (2 chunks), grid of 2
    model_bf16 = CGMLPPallas(tau, num_hidden=3, layer_width_mul=2, key=k_model)
    reps2 = {(0, 0): jax.random.normal(k_x2, (2, B2, A2, T, 1), jnp.float32)}
    mask2 = jax.random.uniform(k_m2, (B2, A2, 1)) > 0.3
    out2 = model_bf16(reps2, mask=mask2)
    jax.block_until_ready(out2[(0, 0)])
    ref2 = model_bf16.reference(reps2, mask=mask2)
    assert out2[(0, 0)].shape == (2, B2, A2, T, 1)
    assert jnp.allclose(out2[(0, 0)], ref2[(0, 0)], atol=1e-1, rtol=1e-1)

    # --- Test 3: mask=None specialization (no mask operand / select) ---
    out3 = model_bf16(reps2, mask=None)
    jax.block_until_ready(out3[(0, 0)])
    ref3 = model_bf16.reference(reps2, mask=None)
    assert jnp.allclose(out3[(0, 0)], ref3[(0, 0)], atol=1e-1, rtol=1e-1)

    print("KERNEL_OK")
</pallas_src>

<mosaic_0001>
module attributes {stable_mosaic.version = 11 : i64} {
  func.func @kernel(%arg0: i32, %arg1: memref<8x32xf32, #tpu.memory_space<vmem>>, %arg2: memref<16x56xf32, #tpu.memory_space<vmem>>, %arg3: memref<16x4xf32, #tpu.memory_space<vmem>>, %arg4: memref<1x32xf32, #tpu.memory_space<vmem>>, %arg5: memref<8x32xf32, #tpu.memory_space<vmem>>) attributes {dimension_semantics = [#tpu.dimension_semantics<parallel>], iteration_bounds = array<i64: 1>, scalar_prefetch = 0 : i64, scratch_operands = 0 : i64, tpu.core_type = #tpu.core_type<tc>, window_params = [{transform_indices = @transform_0, window_bounds = array<i64: 8, 32>}, {pipeline_mode = #tpu.pipeline_mode<synchronous>, transform_indices = @transform_1, window_bounds = array<i64: 16, 56>}, {pipeline_mode = #tpu.pipeline_mode<synchronous>, transform_indices = @transform_2, window_bounds = array<i64: 16, 4>}, {transform_indices = @transform_3, window_bounds = array<i64: 1, 32>}, {transform_indices = @transform_4, window_bounds = array<i64: 8, 32>}]} {
    %c0 = arith.constant 0 : index
    %c0_0 = arith.constant 0 : index
    %0 = vector.load %arg2[%c0, %c0_0] : memref<16x56xf32, #tpu.memory_space<vmem>>, vector<16x56xf32>
    %c0_1 = arith.constant 0 : index
    %c0_2 = arith.constant 0 : index
    %1 = vector.load %arg3[%c0_1, %c0_2] : memref<16x4xf32, #tpu.memory_space<vmem>>, vector<16x4xf32>
    %2 = vector.extract_strided_slice %0 {offsets = [0, 0], sizes = [16, 8], strides = [1, 1]} : vector<16x56xf32> to vector<16x8xf32>
    %3 = vector.extract_strided_slice %0 {offsets = [0, 8], sizes = [16, 16], strides = [1, 1]} : vector<16x56xf32> to vector<16x16xf32>
    %4 = vector.extract_strided_slice %0 {offsets = [0, 24], sizes = [16, 16], strides = [1, 1]} : vector<16x56xf32> to vector<16x16xf32>
    %5 = vector.extract_strided_slice %0 {offsets = [0, 40], sizes = [16, 16], strides = [1, 1]} : vector<16x56xf32> to vector<16x16xf32>
    %6 = vector.extract_strided_slice %1 {offsets = [0, 0], sizes = [16, 1], strides = [1, 1]} : vector<16x4xf32> to vector<16x1xf32>
    %7 = vector.extract_strided_slice %1 {offsets = [0, 1], sizes = [16, 1], strides = [1, 1]} : vector<16x4xf32> to vector<16x1xf32>
    %8 = vector.extract_strided_slice %1 {offsets = [0, 2], sizes = [16, 1], strides = [1, 1]} : vector<16x4xf32> to vector<16x1xf32>
    %9 = vector.extract_strided_slice %1 {offsets = [0, 3], sizes = [16, 1], strides = [1, 1]} : vector<16x4xf32> to vector<16x1xf32>
    %c0_3 = arith.constant 0 : index
    %c0_4 = arith.constant 0 : index
    %10 = vector.load %arg1[%c0_3, %c0_4] : memref<8x32xf32, #tpu.memory_space<vmem>>, vector<8x32xf32>
    %cst = arith.constant dense<0.000000e+00> : vector<16x32xf32>
    %11 = tpu.matmul %2, %10, %cst {dimension_numbers = #tpu.dot_dimension_numbers<[1], [0], [0], [1], [0, 0, 1, 1], [], []>} : vector<16x8xf32>, vector<8x32xf32>, vector<16x32xf32> -> vector<16x32xf32>
    %12 = vector.broadcast %6 : vector<16x1xf32> to vector<16x32xf32>
    %13 = arith.addf %11, %12 : vector<16x32xf32>
    %14 = math.tanh %13 : vector<16x32xf32>
    %cst_5 = arith.constant dense<0.000000e+00> : vector<16x32xf32>
    %15 = tpu.matmul %3, %14, %cst_5 {dimension_numbers = #tpu.dot_dimension_numbers<[1], [0], [0], [1], [0, 0, 1, 1], [], []>} : vector<16x16xf32>, vector<16x32xf32>, vector<16x32xf32> -> vector<16x32xf32>
    %16 = vector.broadcast %7 : vector<16x1xf32> to vector<16x32xf32>
    %17 = arith.addf %15, %16 : vector<16x32xf32>
    %18 = math.tanh %17 : vector<16x32xf32>
    %cst_6 = arith.constant dense<0.000000e+00> : vector<16x32xf32>
    %19 = tpu.matmul %4, %18, %cst_6 {dimension_numbers = #tpu.dot_dimension_numbers<[1], [0], [0], [1], [0, 0, 1, 1], [], []>} : vector<16x16xf32>, vector<16x32xf32>, vector<16x32xf32> -> vector<16x32xf32>
    %20 = vector.broadcast %8 : vector<16x1xf32> to vector<16x32xf32>
    %21 = arith.addf %19, %20 : vector<16x32xf32>
    %22 = math.tanh %21 : vector<16x32xf32>
    %cst_7 = arith.constant dense<0.000000e+00> : vector<16x32xf32>
    %23 = tpu.matmul %5, %22, %cst_7 {dimension_numbers = #tpu.dot_dimension_numbers<[1], [0], [0], [1], [0, 0, 1, 1], [], []>} : vector<16x16xf32>, vector<16x32xf32>, vector<16x32xf32> -> vector<16x32xf32>
    %24 = vector.extract_strided_slice %23 {offsets = [0, 0], sizes = [8, 32], strides = [1, 1]} : vector<16x32xf32> to vector<8x32xf32>
    %25 = vector.extract_strided_slice %9 {offsets = [0, 0], sizes = [8, 1], strides = [1, 1]} : vector<16x1xf32> to vector<8x1xf32>
    %26 = vector.broadcast %25 : vector<8x1xf32> to vector<8x32xf32>
    %27 = arith.addf %24, %26 : vector<8x32xf32>
    %c0_8 = arith.constant 0 : index
    %c0_9 = arith.constant 0 : index
    %28 = vector.load %arg4[%c0_8, %c0_9] : memref<1x32xf32, #tpu.memory_space<vmem>>, vector<1x32xf32>
    %29 = vector.shape_cast %28 : vector<1x32xf32> to vector<1x32xf32>
    %30 = vector.broadcast %29 : vector<1x32xf32> to vector<8x32xf32>
    %cst_10 = arith.constant 0.000000e+00 : f32
    %31 = vector.broadcast %cst_10 : f32 to vector<8x32xf32>
    %32 = arith.cmpf one, %30, %31 : vector<8x32xf32>
    %cst_11 = arith.constant 0.000000e+00 : f32
    %33 = vector.broadcast %cst_11 : f32 to vector<8x32xf32>
    %34 = arith.select %32, %27, %33 : vector<8x32xi1>, vector<8x32xf32>
    %c0_12 = arith.constant 0 : index
    %c0_13 = arith.constant 0 : index
    %35 = vector.load %arg5[%c0_12, %c0_13] : memref<8x32xf32, #tpu.memory_space<vmem>>, vector<8x32xf32>
    tpu.vector_store %arg5[%c0_12, %c0_13], %34 {strides = array<i32>} : memref<8x32xf32, #tpu.memory_space<vmem>>, vector<8x32xf32>,
    return
  }
  func.func @transform_0(%arg0: i32) -> (i32, i32) {
    %c0_i32 = arith.constant 0 : i32
    %c0_i32_0 = arith.constant 0 : i32
    return %c0_i32, %arg0 : i32, i32
  }
  func.func @transform_1(%arg0: i32) -> (i32, i32) {
    %c0_i32 = arith.constant 0 : i32
    %c0_i32_0 = arith.constant 0 : i32
    %c0_i32_1 = arith.constant 0 : i32
    return %c0_i32, %c0_i32_0 : i32, i32
  }
  func.func @transform_2(%arg0: i32) -> (i32, i32) {
    %c0_i32 = arith.constant 0 : i32
    %c0_i32_0 = arith.constant 0 : i32
    %c0_i32_1 = arith.constant 0 : i32
    return %c0_i32, %c0_i32_0 : i32, i32
  }
  func.func @transform_3(%arg0: i32) -> (i32, i32) {
    %c0_i32 = arith.constant 0 : i32
    %c0_i32_0 = arith.constant 0 : i32
    return %c0_i32, %arg0 : i32, i32
  }
  func.func @transform_4(%arg0: i32) -> (i32, i32) {
    %c0_i32 = arith.constant 0 : i32
    %c0_i32_0 = arith.constant 0 : i32
    return %c0_i32, %arg0 : i32, i32
  }
}

</mosaic_0001>

<bundles_post_ra>
// kernel: tpu_custom_call.1
= control target key start
LH: loop header
LB: loop body
LE: loop exit
PB: predicated region body
PF: predicated region fallthrough
CT: control target
= control target key end

     0   :  { %9 = vsyncpa [#allocation3], 0  ;;  %s611_s0 = inlined_call_operand.hbm [shape: f32[8,32], index: 0, kind: input, shape index: {}]   ;;  %s612_s1 = inlined_call_operand.vmem [shape: f32[16,56], index: 1, kind: input, shape index: {}]   ;;  %s613_s2 = inlined_call_operand.vmem [shape: f32[16,4], index: 2, kind: input, shape index: {}]   ;;  %s614_s3 = inlined_call_operand.vmem [shape: f32[1,32], index: 3, kind: input, shape index: {}]   ;;  %s615_s4 = inlined_call_operand.hbm [shape: f32[8,32], index: 4, kind: output, shape index: {}]  }
   0x1   :  { %10 = vsyncpa [#allocation4], 0  ;;  %s550_s15 = smov [#allocation2]  }
   0x2   :  { %s17_s16 = sshll.u32 %s550_s15, 4  ;;  %s18_s16 = int_to_ptr.vmem [resolvable:$true] %s17_s16 }
   0x3   :  { %s514_s17 = scalar_lea.vmem %s18_s16, 128  ;;  %p519_p1 = scmp.lt.s32.totalorder %s18_s16, %s18_s16 }
   0x4   :  { %p515_p0 = scmp.ne.s32.totalorder %s18_s16, %s514_s17  ;;  %p520_p2 = scmp.lt.s32.totalorder %s514_s17, %s514_s17 }
   0x6   :  { %p521_p3 = por %p520_p2, %p519_p1 }
   0x8   :  { %p522_p4 = pnand %p521_p3, %p515_p0 }
   0xa   :  { %525 = shalt.err (!%p522_p4)
}
   0xb   :  { %20 = dma.hbm_to_vmem [thread:$0]  %s611_s0, 128, %s18_s16, [#allocation3]  }
   0xc   :  { %546 = dma.done.wait [#allocation3], 128  }
   0xd   :  { %547 = vsyncadd [#allocation3], 4294967168  ;;  %v551_v0 = vmov 0   ;;  %vm45_vm0 = vcmask 64512   ;;  %v34_v1 = vld [vmem:[#allocation2] sm:$0xff]  ;;  %v31_v3 = vld [vmem:[%s612_s1 + $0x8] sm:$0xff] }
   0xe   :  { %488 = vset.pattern.permute.xlu0 %v551_v0  ;;  %v30_v2 = vld [vmem:[%s612_s1] sm:$0xff]  ;;  %453 = vmatprep.subr.mxu0 %v34_v1  ;;  %v33_v4 = vld [vmem:[%s613_s2 + $0x8] sm:$0xff]  ;;  %s552_s27 = smov 120   ;;  %v553_v6 = vmov 1   ;;  %s554_s1 = smov 104   ;;  %vm141_vm1 = vcmask 130048  }
   0xf   :  { %455 = vmatprep.mubr.msk.f32.mxu0 %vm45_vm0, %v30_v2  ;;  %454 = vmatpush3.msra.mxu0 %v34_v1  ;;  %v32_v5 = vld [vmem:[%s613_s2] sm:$0xff]  ;;  %v555_v19 = vmov 2   ;;  %s556_s2 = smov 88   ;;  %v557_v30 = vmov 3   ;;  %s558_s30 = smov [#allocation5]   ;;  %vm412_vm3 = vcmask 261120  }
  0x10   :  { %42 = vperm.xlu0 %488, %v33_v4   ;;  %456 = vmatmul.mubr.msk.f32.vlgmr.msra.gmra.mxu0 %vm45_vm0, %v31_v3  ;;  %v437_v39 = vld [vmem:[%s614_s3] ss:$0 sm:$0xff]  ;;  %s420_s5 = sshll.u32 %s558_s30, 4  ;;  %s421_s5 = int_to_ptr.vmem [resolvable:$true] %s420_s5 }
  0x11   :  { %137 = vrot.lane.b32.xlu1 %v30_v2, %s552_s27  ;;  %vm410_vm2 = vcmp.ne.f32.partialorder %v437_v39, 0.0  ;;  %s526_s6 = scalar_lea.vmem %s421_s5, 128  ;;  %p531_p6 = scmp.lt.s32.totalorder %s421_s5, %s421_s5 }
  0x12   :  { %490 = vset.pattern.permute.xlu1 %v553_v6  ;;  %p527_p5 = scmp.ne.s32.totalorder %s421_s5, %s526_s6  ;;  %p532_p7 = scmp.lt.s32.totalorder %s526_s6, %s526_s6 }
  0x14   :  { %37 = vperm.xlu0 %488, %v32_v5   ;;  %p533_p8 = por %p532_p7, %p531_p6 }
  0x15   :  { %139 = vrot.lane.b32.xlu1 %v31_v3, %s552_s27 }
  0x16   :  { %p534_p9 = pnand %p533_p8, %p527_p5 }
  0x18   :  { %489 = vset.pattern.permute.xlu0 %v553_v6 }
  0x19   :  { %134 = vperm.xlu0 %489, %v33_v4   ;;  %130 = vperm.xlu1 %490, %v32_v5  }
  0x1d   :  { %231 = vrot.lane.b32.xlu1 %v30_v2, %s554_s1  ;;  %233 = vrot.lane.b32.xlu0 %v31_v3, %s554_s1 }
  0x1e   :  { %491 = vset.pattern.permute.xlu1 %v555_v19  ;;  %492 = vset.pattern.permute.xlu0 %v555_v19 }
  0x21   :  { %228 = vperm.xlu1 %491, %v33_v4   ;;  %224 = vperm.xlu0 %492, %v32_v5  }
  0x25   :  { %316 = vrot.lane.b32.xlu1 %v30_v2, %s556_s2  ;;  %493 = vset.pattern.permute.xlu0 %v557_v30 }
  0x26   :  { %399 = vperm.xlu0 %493, %v32_v5  }
  0x29   :  { %318 = vrot.lane.b32.xlu1 %v31_v3, %s556_s2 }
  0x83   :  { %v138_v7 = vpop.permute.xlu1 %137 }
  0x84   :  { %462 = vmatprep.mubr.msk.f32.mxu1 %vm141_vm1, %v138_v7 }
  0x87   :  { %v140_v16 = vpop.permute.xlu1 %139 }
  0x8b   :  { %v43_v8 = vpop.permute.xlu0 %42 }
  0x8f   :  { %v38_v11 = vpop.permute.xlu0 %37 }
  0x94   :  { %v131_v17 = vpop.permute.xlu1 %130  ;;  %v135_v20 = vpop.permute.xlu0 %134 }
  0x98   :  { %v232_v18 = vpop.permute.xlu1 %231  ;;  %v234_v27 = vpop.permute.xlu0 %233 }
  0x99   :  { %469 = vmatprep.mubr.msk.f32.mxu0 %vm141_vm1, %v232_v18 }
  0x9c   :  { %v229_v28 = vpop.permute.xlu1 %228  ;;  %v225_v32 = vpop.permute.xlu0 %224 }
  0xa0   :  { %v317_v29 = vpop.permute.xlu1 %316 }
  0xa1   :  { %v400_v41 = vpop.permute.xlu0 %399 }
  0xa4   :  { %v319_v38 = vpop.permute.xlu1 %318 }
  0xd0   :  { %v457_v9 = vpop.f32.mrf.mxu0 }
  0xd1   :  { %v124_v10 = vadd.f32 %v457_v9, %v43_v8 }
  0xd2   :  { %v118_v12 = vpop.f32.mrf.mxu0 }
  0xd3   :  { %494 = vtanh.f32 %v124_v10  ;;  %v119_v13 = vadd.f32 %v118_v12, %v38_v11 }
  0xd5   :  { %496 = vtanh.f32 %v119_v13 }
  0xe0   :  { %v495_v14 = vpop.eup %494 }
  0xe1   :  { %458 = vmatprep.subr.mxu1 %v495_v14 }
  0xe2   :  { %v497_v15 = vpop.eup %496  ;;  %459 = vmatpush3.msra.mxu1 %v495_v14 }
  0xe3   :  { %460 = vmatprep.subr.mxu1 %v497_v15 }
  0xe4   :  { %461 = vmatpush3.msra.mxu1 %v497_v15 }
  0xe5   :  { %463 = vmatmul.mubr.msk.f32.vlgmr.msra.gmra.mxu1 %vm141_vm1, %v140_v16 }
  0xe6   :  { %476 = vmatprep.mubr.msk.f32.mxu1 %vm141_vm1, %v317_v29 }
 0x1a5   :  { %v464_v21 = vpop.f32.mrf.mxu1 }
 0x1a6   :  { %v218_v22 = vadd.f32 %v464_v21, %v135_v20 }
 0x1a7   :  { %v212_v23 = vpop.f32.mrf.mxu1 }
 0x1a8   :  { %498 = vtanh.f32 %v218_v22  ;;  %v213_v24 = vadd.f32 %v212_v23, %v131_v17 }
 0x1aa   :  { %500 = vtanh.f32 %v213_v24 }
 0x1b5   :  { %v499_v25 = vpop.eup %498 }
 0x1b6   :  { %465 = vmatprep.subr.mxu0 %v499_v25 }
 0x1b7   :  { %v501_v26 = vpop.eup %500  ;;  %466 = vmatpush3.msra.mxu0 %v499_v25 }
 0x1b8   :  { %467 = vmatprep.subr.mxu0 %v501_v26 }
 0x1b9   :  { %468 = vmatpush3.msra.mxu0 %v501_v26 }
 0x1ba   :  { %470 = vmatmul.mubr.msk.f32.vlgmr.msra.gmra.mxu0 %vm141_vm1, %v234_v27 }
 0x27a   :  { %v471_v31 = vpop.f32.mrf.mxu0 }
 0x27b   :  { %v311_v33 = vadd.f32 %v471_v31, %v229_v28 }
 0x27c   :  { %v305_v34 = vpop.f32.mrf.mxu0 }
 0x27d   :  { %502 = vtanh.f32 %v311_v33  ;;  %v306_v35 = vadd.f32 %v305_v34, %v225_v32 }
 0x27f   :  { %504 = vtanh.f32 %v306_v35 }
 0x28a   :  { %v503_v36 = vpop.eup %502 }
 0x28b   :  { %472 = vmatprep.subr.mxu1 %v503_v36 }
 0x28c   :  { %v505_v37 = vpop.eup %504  ;;  %473 = vmatpush3.msra.mxu1 %v503_v36 }
 0x28d   :  { %474 = vmatprep.subr.mxu1 %v505_v37 }
 0x28e   :  { %475 = vmatpush3.msra.mxu1 %v505_v37 }
 0x28f   :  { %477 = vmatmul.mubr.msk.f32.vlgmr.msra.gmra.mxu1 %vm141_vm1, %v319_v38 }
 0x34f   :  { %v478_v40 = vpop.f32.mrf.mxu1 }
 0x351   :  { %v390_v42 = vpop.f32.mrf.mxu1 }
 0x352   :  { %v402_v43 = vadd.f32 %v400_v41, %v390_v42 }
 0x354   :  { %v411_v44 = vsel %vm410_vm2, %v402_v43, 0.0 }
 0x355   :  { %413 = vst.msk [vmem:[#allocation5] sm:$0xff] %vm412_vm3, %v411_v44 }
 0x356   :  { %537 = shalt.err (!%p534_p9)
}
 0x357   :  { %423 = dma.vmem_to_hbm [thread:$0]  %s421_s5, 128, %s615_s4, [#allocation4]  }
 0x358   :  { %548 = dma.done.wait [#allocation4], 128  }
 0x359   :  { %549 = vsyncadd [#allocation4], 4294967168 }
 0x35a   :  { %427 = vsyncpa [#allocation3], 1 }
 0x35b   :  { %428 = vsyncpa [#allocation4], 1 }

</bundles_post_ra>
